<compile_context>
chip_gen: v7x
topology: tpu7x:2x2x1
jax: 0.10.0
libtpu: 0.0.40
codegen_flags: <defaults>
</compile_context>

<pallas_src>
import functools
import math

import numpy as np
import jax
import jax.numpy as jnp
from jax.experimental import pallas as pl
from jax.experimental.pallas import tpu as pltpu

LANE = 128


def _round_up(x, m):
    return (x + m - 1) // m * m


# ----------------------------------------------------------------------------
# Glue (plain JAX): symmetrically-normalized dense adjacency (gcn_norm + loops)
# ----------------------------------------------------------------------------
def build_norm_adj(edge_index, edge_weight, num_nodes):
    # TODO(synk): matches PyG gcn_norm only when the edge list has no
    # pre-existing self-loops (add_remaining_self_loops would skip those).
    src, dst = edge_index[0], edge_index[1]
    loop = jnp.arange(num_nodes, dtype=src.dtype)
    src = jnp.concatenate([src, loop])
    dst = jnp.concatenate([dst, loop])
    w = jnp.concatenate([edge_weight, jnp.ones((num_nodes,), edge_weight.dtype)])
    deg = jnp.zeros((num_nodes,), w.dtype).at[dst].add(w)
    deg_inv_sqrt = jnp.where(deg > 0, jax.lax.rsqrt(deg), 0.0)
    norm = deg_inv_sqrt[src] * w * deg_inv_sqrt[dst]
    # out[i] = sum over edges (src -> dst=i) norm * x[src]  =>  A_hat[dst, src]
    a_hat = jnp.zeros((num_nodes, num_nodes), w.dtype).at[dst, src].add(norm)
    return a_hat


# ----------------------------------------------------------------------------
# Pallas: one tiled GCN layer  out = (A_hat @ H) @ W + b   [+ PReLU on last]
# ----------------------------------------------------------------------------
def _gcn_layer_kernel(a_ref, h_ref, w_ref, b_ref, alpha_ref, o_ref, acc_ref,
                      *, apply_prelu):
    k = pl.program_id(1)

    @pl.when(k == 0)
    def _():
        acc_ref[...] = jnp.zeros_like(acc_ref)

    # Accumulate the big (N^2) matmul: A_hat row-tile @ H K-tile.
    acc_ref[...] += jnp.dot(a_ref[...], h_ref[...],
                            preferred_element_type=jnp.float32)

    @pl.when(k == pl.num_programs(1) - 1)
    def _():
        out = jnp.dot(acc_ref[...], w_ref[...],
                      preferred_element_type=jnp.float32) + b_ref[...]
        if apply_prelu:
            out = jnp.where(out > 0, out, alpha_ref[...] * out)
        o_ref[...] = out.astype(o_ref.dtype)


def _gcn_layer(a_pad, h_in, w_pad, b_pad, alpha_pad, *, apply_prelu,
               block_m, block_k):
    n_pad = a_pad.shape[0]
    w_in = h_in.shape[1]          # padded input width (multiple of 128)
    h_out = w_pad.shape[1]        # padded output width (multiple of 128)
    grid = (n_pad // block_m, n_pad // block_k)

    kernel = functools.partial(_gcn_layer_kernel, apply_prelu=apply_prelu)
    return pl.pallas_call(
        kernel,
        out_shape=jax.ShapeDtypeStruct((n_pad, h_out), jnp.float32),
        grid_spec=pltpu.PrefetchScalarGridSpec(
            num_scalar_prefetch=0,
            grid=grid,
            in_specs=[
                pl.BlockSpec((block_m, block_k), lambda i, k: (i, k)),   # A tile
                pl.BlockSpec((block_k, w_in), lambda i, k: (k, 0)),      # H tile
                pl.BlockSpec((w_in, h_out), lambda i, k: (0, 0)),        # W (resident)
                pl.BlockSpec((1, h_out), lambda i, k: (0, 0)),           # bias
                pl.BlockSpec((1, h_out), lambda i, k: (0, 0)),           # PReLU alpha
            ],
            out_specs=pl.BlockSpec((block_m, h_out), lambda i, k: (i, 0)),
            scratch_shapes=[pltpu.VMEM((block_m, w_in), jnp.float32)],
        ),
        compiler_params=pltpu.CompilerParams(
            dimension_semantics=("parallel", "arbitrary"),
            vmem_limit_bytes=48 * 1024 * 1024,
        ),
    )(a_pad, h_in, w_pad, b_pad, alpha_pad)


# ----------------------------------------------------------------------------
# Encoder forward: 4 GCN layers + per-channel PReLU
# ----------------------------------------------------------------------------
def encoder_forward(a_hat, x, params, *, block_m=512, block_k=512):
    (w1, b1, w2, b2, w3, b3, w4, b4, alpha) = params
    n, cin = x.shape
    hidden = w1.shape[1]

    cin_pad = _round_up(cin, LANE)
    hid_pad = _round_up(hidden, LANE)

    # Tile sizes: lane-aligned, never larger than the padded problem.
    block_m = min(block_m, _round_up(n, LANE))
    block_k = min(block_k, _round_up(n, LANE))
    tile_lcm = block_m * block_k // math.gcd(block_m, block_k)
    n_pad = _round_up(n, tile_lcm)

    # Zero-padding: padded A rows/cols are 0, so padded nodes / padded channels
    # never leak into the valid region; we slice them off at the end.
    a_pad = jnp.zeros((n_pad, n_pad), jnp.float32).at[:n, :n].set(a_hat)
    x_pad = jnp.zeros((n_pad, cin_pad), jnp.float32).at[:n, :cin].set(x)

    def pad_w(w):
        wi, wo = w.shape
        return jnp.zeros((_round_up(wi, LANE), hid_pad), jnp.float32).at[:wi, :wo].set(w)

    def pad_row(v):
        return jnp.zeros((1, hid_pad), jnp.float32).at[:, :hidden].set(v)

    dummy_alpha = jnp.zeros((1, hid_pad), jnp.float32)   # unused when apply_prelu=False

    h = _gcn_layer(a_pad, x_pad, pad_w(w1), pad_row(b1), dummy_alpha,
                   apply_prelu=False, block_m=block_m, block_k=block_k)
    h = _gcn_layer(a_pad, h, pad_w(w2), pad_row(b2), dummy_alpha,
                   apply_prelu=False, block_m=block_m, block_k=block_k)
    h = _gcn_layer(a_pad, h, pad_w(w3), pad_row(b3), dummy_alpha,
                   apply_prelu=False, block_m=block_m, block_k=block_k)
    h = _gcn_layer(a_pad, h, pad_w(w4), pad_row(b4), pad_row(alpha),
                   apply_prelu=True, block_m=block_m, block_k=block_k)
    return h[:n, :hidden]


# ----------------------------------------------------------------------------
# Pure-JAX reference (same math, no Pallas, no padding) for verification
# ----------------------------------------------------------------------------
def encoder_reference(a_hat, x, params):
    (w1, b1, w2, b2, w3, b3, w4, b4, alpha) = params
    h = x
    for w, b in ((w1, b1), (w2, b2), (w3, b3), (w4, b4)):
        h = a_hat @ (h @ w) + b
    return jnp.where(h > 0, h, alpha * h)


if __name__ == "__main__":
    # Small, deterministic problem: N nodes, in_channels -> hidden_channels.
    # N=256 with 128x128 tiles -> grid (2, 2): exercises the row-parallel axis
    # and the K reduction / accumulator path.
    N = 256
    in_channels = 8
    hidden_channels = 32
    num_edges = 1024

    key = jax.random.PRNGKey(0)
    k_x, k_src, k_dst, k_w, k_p = jax.random.split(key, 5)

    # data.x, data.edge_index, data.edge_attr
    x = jax.random.normal(k_x, (N, in_channels), dtype=jnp.float32)
    edge_index = jnp.stack([
        jax.random.randint(k_src, (num_edges,), 0, N),
        jax.random.randint(k_dst, (num_edges,), 0, N),
    ]).astype(jnp.int32)
    edge_attr = jax.random.uniform(k_w, (num_edges,), dtype=jnp.float32,
                                   minval=0.1, maxval=1.0)

    # Deterministic parameter init (glorot-ish weights, zero bias,
    # PReLU slope = 0.25 like PyTorch default).
    kw1, kw2, kw3, kw4 = jax.random.split(k_p, 4)

    def glorot(k, fan_in, fan_out):
        limit = float(np.sqrt(6.0 / (fan_in + fan_out)))
        return jax.random.uniform(k, (fan_in, fan_out), jnp.float32,
                                  minval=-limit, maxval=limit)

    w1 = glorot(kw1, in_channels, hidden_channels)
    w2 = glorot(kw2, hidden_channels, hidden_channels)
    w3 = glorot(kw3, hidden_channels, hidden_channels)
    w4 = glorot(kw4, hidden_channels, hidden_channels)
    b1 = jnp.zeros((1, hidden_channels), jnp.float32)
    b2 = jnp.zeros((1, hidden_channels), jnp.float32)
    b3 = jnp.zeros((1, hidden_channels), jnp.float32)
    b4 = jnp.zeros((1, hidden_channels), jnp.float32)
    alpha = jnp.full((1, hidden_channels), 0.25, jnp.float32)
    params = (w1, b1, w2, b2, w3, b3, w4, b4, alpha)

    # Dense normalized adjacency (glue, plain JAX)
    a_hat = build_norm_adj(edge_index, edge_attr, N)

    out = encoder_forward(a_hat, x, params, block_m=128, block_k=128)
    out = jax.block_until_ready(out)

    ref = encoder_reference(a_hat, x, params)
    np.testing.assert_allclose(np.asarray(out), np.asarray(ref),
                               rtol=1e-4, atol=1e-4)
    assert np.all(np.isfinite(np.asarray(out)))
    print("KERNEL_OK")
</pallas_src>

<mosaic_0001>
module attributes {stable_mosaic.version = 11 : i64} {
  func.func @_gcn_layer_kernel(%arg0: i32, %arg1: i32, %arg2: memref<128x128xf32, #tpu.memory_space<vmem>>, %arg3: memref<128x128xf32, #tpu.memory_space<vmem>>, %arg4: memref<128x128xf32, #tpu.memory_space<vmem>>, %arg5: memref<1x128xf32, #tpu.memory_space<vmem>>, %arg6: memref<1x128xf32, #tpu.memory_space<vmem>>, %arg7: memref<128x128xf32, #tpu.memory_space<vmem>>, %arg8: memref<128x128xf32, #tpu.memory_space<vmem>>) attributes {dimension_semantics = [#tpu.dimension_semantics<parallel>, #tpu.dimension_semantics<arbitrary>], iteration_bounds = array<i64: 2, 2>, scalar_prefetch = 0 : i64, scratch_operands = 1 : i64, tpu.core_type = #tpu.core_type<tc>, window_params = [{transform_indices = @transform_0, window_bounds = array<i64: 128, 128>}, {transform_indices = @transform_1, window_bounds = array<i64: 128, 128>}, {pipeline_mode = #tpu.pipeline_mode<synchronous>, transform_indices = @transform_2, window_bounds = array<i64: 128, 128>}, {pipeline_mode = #tpu.pipeline_mode<synchronous>, transform_indices = @transform_3, window_bounds = array<i64: 1, 128>}, {pipeline_mode = #tpu.pipeline_mode<synchronous>, transform_indices = @transform_4, window_bounds = array<i64: 1, 128>}, {transform_indices = @transform_5, window_bounds = array<i64: 128, 128>}]} {
    %c0_i32 = arith.constant 0 : i32
    %0 = arith.cmpi eq, %arg1, %c0_i32 : i32
    %1 = arith.extui %0 : i1 to i32
    %c0_i32_0 = arith.constant 0 : i32
    %2 = arith.cmpi ne, %1, %c0_i32_0 : i32
    scf.if %2 {
      %cst_9 = arith.constant 0.000000e+00 : f32
      %12 = vector.broadcast %cst_9 : f32 to vector<128x128xf32>
      %c0_10 = arith.constant 0 : index
      %c0_11 = arith.constant 0 : index
      %13 = vector.load %arg8[%c0_10, %c0_11] : memref<128x128xf32, #tpu.memory_space<vmem>>, vector<128x128xf32>
      tpu.vector_store %arg8[%c0_10, %c0_11], %12 {strides = array<i32>} : memref<128x128xf32, #tpu.memory_space<vmem>>, vector<128x128xf32>,
    } else {
    }
    %c0 = arith.constant 0 : index
    %c0_1 = arith.constant 0 : index
    %3 = vector.load %arg8[%c0, %c0_1] : memref<128x128xf32, #tpu.memory_space<vmem>>, vector<128x128xf32>
    %c0_2 = arith.constant 0 : index
    %c0_3 = arith.constant 0 : index
    %4 = vector.load %arg2[%c0_2, %c0_3] : memref<128x128xf32, #tpu.memory_space<vmem>>, vector<128x128xf32>
    %c0_4 = arith.constant 0 : index
    %c0_5 = arith.constant 0 : index
    %5 = vector.load %arg3[%c0_4, %c0_5] : memref<128x128xf32, #tpu.memory_space<vmem>>, vector<128x128xf32>
    %cst = arith.constant dense<0.000000e+00> : vector<128x128xf32>
    %6 = tpu.matmul %4, %5, %cst {dimension_numbers = #tpu.dot_dimension_numbers<[1], [0], [0], [1], [0, 0, 1, 1], [], []>} : vector<128x128xf32>, vector<128x128xf32>, vector<128x128xf32> -> vector<128x128xf32>
    %7 = arith.addf %3, %6 : vector<128x128xf32>
    %c0_6 = arith.constant 0 : index
    %c0_7 = arith.constant 0 : index
    %8 = vector.load %arg8[%c0_6, %c0_7] : memref<128x128xf32, #tpu.memory_space<vmem>>, vector<128x128xf32>
    tpu.vector_store %arg8[%c0_6, %c0_7], %7 {strides = array<i32>} : memref<128x128xf32, #tpu.memory_space<vmem>>, vector<128x128xf32>,
    %c1_i32 = arith.constant 1 : i32
    %9 = arith.cmpi eq, %arg1, %c1_i32 : i32
    %10 = arith.extui %9 : i1 to i32
    %c0_i32_8 = arith.constant 0 : i32
    %11 = arith.cmpi ne, %10, %c0_i32_8 : i32
    scf.if %11 {
      %c0_9 = arith.constant 0 : index
      %c0_10 = arith.constant 0 : index
      %12 = vector.load %arg8[%c0_9, %c0_10] : memref<128x128xf32, #tpu.memory_space<vmem>>, vector<128x128xf32>
      %c0_11 = arith.constant 0 : index
      %c0_12 = arith.constant 0 : index
      %13 = vector.load %arg4[%c0_11, %c0_12] : memref<128x128xf32, #tpu.memory_space<vmem>>, vector<128x128xf32>
      %cst_13 = arith.constant dense<0.000000e+00> : vector<128x128xf32>
      %14 = tpu.matmul %12, %13, %cst_13 {dimension_numbers = #tpu.dot_dimension_numbers<[1], [0], [0], [1], [0, 0, 1, 1], [], []>} : vector<128x128xf32>, vector<128x128xf32>, vector<128x128xf32> -> vector<128x128xf32>
      %c0_14 = arith.constant 0 : index
      %c0_15 = arith.constant 0 : index
      %15 = vector.load %arg5[%c0_14, %c0_15] : memref<1x128xf32, #tpu.memory_space<vmem>>, vector<1x128xf32>
      %16 = vector.broadcast %15 : vector<1x128xf32> to vector<128x128xf32>
      %17 = arith.addf %14, %16 : vector<128x128xf32>
      %c0_16 = arith.constant 0 : index
      %c0_17 = arith.constant 0 : index
      %18 = vector.load %arg7[%c0_16, %c0_17] : memref<128x128xf32, #tpu.memory_space<vmem>>, vector<128x128xf32>
      tpu.vector_store %arg7[%c0_16, %c0_17], %17 {strides = array<i32>} : memref<128x128xf32, #tpu.memory_space<vmem>>, vector<128x128xf32>,
    } else {
    }
    return
  }
  func.func @transform_0(%arg0: i32, %arg1: i32) -> (i32, i32) {
    %c0_i32 = arith.constant 0 : i32
    return %arg0, %arg1 : i32, i32
  }
  func.func @transform_1(%arg0: i32, %arg1: i32) -> (i32, i32) {
    %c0_i32 = arith.constant 0 : i32
    %c0_i32_0 = arith.constant 0 : i32
    return %arg1, %c0_i32 : i32, i32
  }
  func.func @transform_2(%arg0: i32, %arg1: i32) -> (i32, i32) {
    %c0_i32 = arith.constant 0 : i32
    %c0_i32_0 = arith.constant 0 : i32
    %c0_i32_1 = arith.constant 0 : i32
    return %c0_i32, %c0_i32_0 : i32, i32
  }
  func.func @transform_3(%arg0: i32, %arg1: i32) -> (i32, i32) {
    %c0_i32 = arith.constant 0 : i32
    %c0_i32_0 = arith.constant 0 : i32
    %c0_i32_1 = arith.constant 0 : i32
    return %c0_i32, %c0_i32_0 : i32, i32
  }
  func.func @transform_4(%arg0: i32, %arg1: i32) -> (i32, i32) {
    %c0_i32 = arith.constant 0 : i32
    %c0_i32_0 = arith.constant 0 : i32
    %c0_i32_1 = arith.constant 0 : i32
    return %c0_i32, %c0_i32_0 : i32, i32
  }
  func.func @transform_5(%arg0: i32, %arg1: i32) -> (i32, i32) {
    %c0_i32 = arith.constant 0 : i32
    %c0_i32_0 = arith.constant 0 : i32
    return %arg0, %c0_i32 : i32, i32
  }
}

</mosaic_0001>

<bundles_post_ra>
// kernel: tpu_custom_call.1
= control target key start
LH: loop header
LB: loop body
LE: loop exit
PB: predicated region body
PF: predicated region fallthrough
CT: control target
= control target key end

     0   :  { %s2068_s0 = inlined_call_operand.hbm [shape: f32[256,256], index: 0, kind: input, shape index: {}]   ;;  %s2069_s1 = inlined_call_operand.hbm [shape: f32[256,128], index: 1, kind: input, shape index: {}]   ;;  %s2070_s2 = inlined_call_operand.hbm [shape: f32[128,128], index: 2, kind: input, shape index: {}]   ;;  %s2071_s3 = inlined_call_operand.vmem [shape: f32[1,128], index: 3, kind: input, shape index: {}]   ;;  %s2072_s4 = inlined_call_operand.vmem [shape: f32[1,128], index: 4, kind: input, shape index: {}]   ;;  %s2073_s5 = inlined_call_operand.hbm [shape: f32[256,128], index: 5, kind: output, shape index: {}]  }
   0x1   :  { %2097 = sst [smem:[#allocation23_spill]] %s2070_s2 }
   0x2   :  { %2098 = sst [smem:[#allocation24_spill]] %s2071_s3 }
   0x3   :  { %2099 = sst [smem:[#allocation25_spill]] %s2073_s5 }
   0x4   :  { %10 = vsyncpa [#allocation4], 0 }
   0x5   :  { %12 = vsyncpa [#allocation4 + $0x1], 0 }
   0x6   :  { %13 = vsyncpa [#allocation7], 0 }
   0x7   :  { %15 = vsyncpa [#allocation7 + $0x1], 0 }
   0x8   :  { %16 = vsyncpa [#allocation5], 0 }
   0x9   :  { %18 = vsyncpa [#allocation5 + $0x1], 0  ;;  %s1629_s18 = smov 0   ;;  %s1631_s19 = smov 0  }
   0xa   :  { %s1633_s20 = smov 0   ;;  %s1635_s21 = smov 0  }
   0xb   :  { %s1637_s22 = smov 0   ;;  %s1639_s4 = smov 0  }
   0xc   :  { %s1641_s23 = smov 0   ;;  %s1643_s24 = smov 0  }
   0xd   :  { %s1645_s25 = smov 0   ;;  %s1647_s26 = smov 0  }
   0xe   :  { %s1649_s27 = smov 0   ;;  %s1651_s28 = smov 0  }
   0xf   :  { %s1653_s29 = smov 0   ;;  %s1655_s30 = smov 0  }
  0x10 LB: > { %2100 = sst [smem:[#allocation14_spill]] %s1535_s18  ;;  %s1696_s6 = sadd.s32 4294967295, %s1587_s30   ;;  %s1587_s30 = sphi %s1655_s30, %s24_s30   ;;  %s1583_s29 = sphi %s1653_s29, %s2158_s29   ;;  %s1579_s28 = sphi %s1651_s28, %s2157_s28   ;;  %s1575_s27 = sphi %s1649_s27, %s2156_s27   ;;  %s1571_s26 = sphi %s1647_s26, %s2155_s26   ;;  %s1567_s25 = sphi %s1645_s25, %s2154_s25   ;;  %s1563_s24 = sphi %s1643_s24, %s2153_s24   ;;  %s1559_s23 = sphi %s1641_s23, %s2152_s23   ;;  %s1555_s4 = sphi %s1639_s4, %s2151_s4   ;;  %s1551_s22 = sphi %s1637_s22, %s2150_s22   ;;  %s1547_s21 = sphi %s1635_s21, %s2149_s21   ;;  %s1543_s20 = sphi %s1633_s20, %s2148_s20   ;;  %s1539_s19 = sphi %s1631_s19, %s2147_s19   ;;  %s1535_s18 = sphi %s1629_s18, %s2144_s18  }
  0x11   : > { %2101 = sst [smem:[#allocation15_spill]] %s1539_s19  ;;  %s898_s7 = sadd.s32 4294967294, %s1587_s30  }
  0x12   : > { %2102 = sst [smem:[#allocation16_spill]] %s1571_s26  ;;  %p58_p0 = scmp.ne.s32.totalorder %s1563_s24, %s1559_s23 }
  0x13   : > { %2103 = sst [smem:[#allocation17_spill]] %s1575_s27  ;;  %p2076_p1 = scmp.eq.s32.totalorder %s1696_s6, 0 }
  0x14   : > { %2104 = sst [smem:[#allocation18_spill]] %s1696_s6  ;;  %p84_p2 = scmp.ne.s32.totalorder %s1551_s22, %s1547_s21 }
  0x15   : > { %p1705_p3 = por %p2076_p1, %p58_p0  ;;  %p170_p4 = scmp.ne.s32.totalorder %s1543_s20, %s1539_s19 }
  0x16   : > { %p1713_p5 = por %p84_p2, %p2076_p1  ;;  %p171_p6 = scmp.eq.s32.totalorder %s1696_s6, 3 }
  0x17   : > { %s2105_s9 = scalar_select %p1705_p3, 1, 0 }
  0x18   : > { %s2106_s10 = scalar_select %p1713_p5, 1, 0 }
  0x19   : > { %p176_p7 = scmp.ne.s32.totalorder %s1539_s19, %s1535_s18  ;;  %p177_p8 = scmp.eq.s32.totalorder %s898_s7, 3 }
  0x1a   : > { %2107 = sst [smem:[#allocation19_spill]] %s2106_s10  ;;  %p1720_p9 = por %p171_p6, %p170_p4 }
  0x1b   : > { %p899_p10 = scmp.ge.s32.totalorder %s1587_s30, 1  ;;  %p1725_p11 = por %p177_p8, %p176_p7 }
  0x1c   : > { %s2108_s11 = scalar_select %p1720_p9, 1, 0 }
  0x1d   : > { %s2110_s12 = scalar_select %p1725_p11, 1, 0 }
  0x1e   : > { %2109 = sst [smem:[#allocation20_spill]] %s2108_s11  ;;  %p184_p12 = scmp.lt.s32.totalorder %s1587_s30, 5 }
  0x1f   : > { %2111 = sst [smem:[#allocation21_spill]] %s2110_s12  ;;  %s1589_s14 = smov [#allocation8]  }
  0x20   : > { %p1730_p13 = pnand %p899_p10, %p184_p12  ;;  %s196_s15 = sshll.u32 %s1589_s14, 4  ;;  %s197_s15 = int_to_ptr.vmem [resolvable:$true] %s196_s15 }
  0x21   : > { %s2114_s2 = sld [smem:[#allocation23_spill]] }
  0x22   : > { %s2112_s13 = scalar_select %p1730_p13, 1, 0 }
  0x23   : > { %p1207_p0 = pneg %p1730_p13 }
  0x25   : > { %p1738_p2 = pnand %p1207_p0, %p2076_p1 }
  0x27   : > { %s1345_s23 = scalar_lea.hbm %s2114_s2, 2048  ;;  %p1347_p6 = pneg %p1738_p2 }
  0x28   : > { %p1346_p4 = scmp.ne.s32.totalorder %s2114_s2, %s1345_s23  ;;  %p1352_p10 = scmp.lt.u32.totalorder %s1345_s23, %s2114_s2 }
  0x2a   : > { %p1348_p7 = pnand %p1347_p6, %p1346_p4 }
  0x2c   : > { %p1349_p8 = pneg %p1348_p7 }
  0x2e   : > { %p1354_p12 = pnand %p1352_p10, %p1349_p8 }
  0x30   : > { %1357 = shalt.err (!%p1354_p12)
}
  0x31   : > { %s1358_s18 = scalar_lea.vmem %s197_s15, 2048  ;;  %p1366_p9 = scmp.lt.s32.totalorder %s197_s15, %s197_s15 }
  0x32   : > { %p1359_p0 = scmp.ne.s32.totalorder %s197_s15, %s1358_s18  ;;  %p1367_p5 = scmp.lt.s32.totalorder %s1358_s18, %s1358_s18 }
  0x34   : > { %p1361_p1 = pnand %p1359_p0, %p1347_p6  ;;  %p1368_p3 = por %p1367_p5, %p1366_p9 }
  0x36   : > { %p1362_p11 = pneg %p1361_p1 }
  0x38   : > { %p1369_p13 = pnand %p1368_p3, %p1362_p11 }
  0x3a   : > { %1372 = shalt.err (!%p1369_p13)
}
  0x3b   : > { %s2081_s8 = smov 128   ;;  %s2083_s12 = smov 8  }
  0x3c   : > { %1210 = dma.hbm_to_vmem [thread:$0]  (!%p1738_p2), %s2114_s2, 2048, %s197_s15, [#allocation7], %s2081_s8, %s2081_s8, %s2083_s12  }
  0x3d   : > { %s33_s21 = sadd.s32 1, %s1579_s28  ;;  %s36_s23 = sadd.s32 1, %s1583_s29 }
  0x3e   : > { %p34_p1 = scmp.ge.s32.totalorder %s33_s21, 2  ;;  %s45_s7 = sadd.s32 1, %s1567_s25 }
  0x3f   : > { %p52_p3 = scmp.ne.s32.totalorder %s1567_s25, %s1563_s24  ;;  %p2096_p5 = scmp.eq.s32.totalorder %s1587_s30, 0 }
  0x40   : > { %s2160_s21 = smov (%p34_p1, %s33_s21), 0  ;;  %s2162_s23 = smov (!%p34_p1, %s36_s23), %s1583_s29 }
  0x41   : > { %2115 = sst [smem:[#allocation22_spill]] %s2160_s21  ;;  %s1771_s16 = ssub.s32 %s1579_s28, %s2160_s21 }
  0x42   : > { %p38_p9 = scmp.ge.s32.totalorder %s2162_s23, 2  ;;  %p69_p11 = scmp.eq.s32.totalorder %s1771_s16, 0 }
  0x43   : > { %p1777_p13 = por %p2096_p5, %p52_p3  ;;  %p2095_p2 = scmp.lt.s32.totalorder %s1587_s30, 4 }
  0x44   : > { %s2164_s23 = smov (%p38_p9, %s2162_s23), 0  ;;  %s216_s14 = sand.u32 1, %s1567_s25  }
  0x45   : > { %s922_s18 = sshll.u32 %s1583_s29, 5  ;;  %s40_s17 = ssub.s32 %s1583_s29, %s2164_s23 }
  0x46   : > { %s42_s8 = sor.u32 %s1771_s16, %s40_s17  ;;  %p158_p4 = scmp.eq.s32.totalorder %s40_s17, 0 }
  0x47   : > { %p43_p6 = scmp.eq.s32.totalorder %s42_s8, 0  ;;  %s902_s12 = sshll.u32 %s216_s14, 7 }
  0x48   : > { %s2117_s2 = sadd.s32 1, %s1543_s20  ;;  %s226_s11 = sadd.s32 %s1579_s28, %s922_s18 }
  0x49   : > { %s1792_s21 = scalar_select %p158_p4, %s1543_s20, %s2117_s2  }
  0x4a   : > { %s1795_s5 = scalar_select %p43_p6, %s1567_s25, %s45_s7  }
  0x4b   : > { %s905_s27 = sshll.u32 %s226_s11, 7  ;;  %s220_s3 = scalar_lea.vmem [#allocation3], %s902_s12 }
  0x4c   : > { %s229_s26 = sshll.u32 %s220_s3, 4  ;;  %s1801_s6 = scalar_lea.hbm %s2068_s0, %s905_s27  ;;  %s1803_s26 = int_to_ptr.vmem [resolvable:$true] %s229_s26 }
  0x4d   : > { %p1809_p7 = pnand %p2095_p2, %p1777_p13  ;;  %s239_s3 = sand.u32 1, %s1587_s30  }
  0x4e   : > { %s1814_s11 = scalar_lea.sflag [#allocation4], %s216_s14  ;;  %s1373_s19 = scalar_lea.hbm %s1801_s6, 2048 }
  0x4f   : > { %p1374_p8 = scmp.ne.s32.totalorder %s1801_s6, %s1373_s19  ;;  %p1375_p10 = pneg %p1809_p7 }
  0x50   : > { %s1378_s8 = scalar_lea.hbm %s2068_s0, 8192  ;;  %p1379_p1 = scmp.lt.u32.totalorder %s1801_s6, %s2068_s0 }
  0x51   : > { %p1376_p12 = pnand %p1375_p10, %p1374_p8  ;;  %p1380_p3 = scmp.lt.u32.totalorder %s1378_s8, %s1373_s19 }
  0x52   : > { %p1382_p13 = scmp.lt.u32.totalorder %s1373_s19, %s1801_s6 }
  0x53   : > { %p1377_p0 = pneg %p1376_p12  ;;  %p1381_p9 = por %p1380_p3, %p1379_p1 }
  0x55   : > { %p1383_p4 = por %p1382_p13, %p1381_p9 }
  0x57   : > { %p1384_p6 = pnand %p1383_p4, %p1377_p0 }
  0x59   : > { %1387 = shalt.err (!%p1384_p6)
}
  0x5a   : > { %s1388_s15 = scalar_lea.vmem %s1803_s26, 2048  ;;  %s1592_s14 = smov [#allocation3]  }
  0x5b   : > { %p1389_p8 = scmp.ne.s32.totalorder %s1803_s26, %s1388_s15  ;;  %s1393_s18 = sshll.u32 %s1592_s14, 4  ;;  %s1394_s18 = int_to_ptr.vmem [resolvable:$false] %s1393_s18 }
  0x5c   : > { %s1395_s17 = scalar_lea.vmem %s1394_s18, 4096  ;;  %p1396_p5 = scmp.lt.s32.totalorder %s1803_s26, %s1394_s18 }
  0x5d   : > { %p1391_p12 = pnand %p1389_p8, %p1375_p10  ;;  %p1397_p1 = scmp.lt.s32.totalorder %s1395_s17, %s1388_s15 }
  0x5f   : > { %p1392_p2 = pneg %p1391_p12  ;;  %p1398_p3 = por %p1397_p1, %p1396_p5 }
  0x61   : > { %p1399_p9 = pnand %p1398_p3, %p1392_p2 }
  0x63   : > { %1402 = shalt.err (!%p1399_p9)
}
  0x64   : > { %s1593_s19 = smov 256   ;;  %s2119_s27 = smov 8  }
  0x65   : > { %s2120_s10 = smov 128   ;;  %s71_s8 = sadd.s32 1, %s1555_s4 }
  0x66   : > { %1214 = dma.hbm_to_vmem [thread:$0]  (!%p1809_p7), %s1801_s6, 2048, %s1803_s26, %s1814_s11, %s1593_s19, %s2120_s10, %s2119_s27  }
  0x67   : > { %p78_p5 = scmp.ne.s32.totalorder %s1555_s4, %s1551_s22  ;;  %p2121_p2 = scmp.eq.s32.totalorder %s1587_s30, 0 }
  0x68   : > { %s1850_s2 = scalar_select %p69_p11, %s1555_s4, %s71_s8  }
  0x69   : > { %p80_p10 = por %p78_p5, %p2121_p2  ;;  %s241_s12 = sand.u32 1, %s1555_s4  }
  0x6a   : > { %s923_s7 = sshll.u32 %s1579_s28, 11  ;;  %s906_s15 = sshll.u32 %s241_s12, 7 }
  0x6b   : > { %s1859_s17 = scalar_lea.hbm %s2069_s1, %s923_s7  ;;  %p2122_p0 = scmp.lt.s32.totalorder %s1587_s30, 4 }
  0x6c   : > { %s243_s6 = scalar_lea.vmem [#allocation6], %s906_s15  ;;  %s1871_s11 = scalar_lea.sflag [#allocation7], %s239_s3 }
  0x6d   : > { %p1863_p7 = pnand %p2122_p0, %p80_p10  ;;  %s250_s16 = sshll.u32 %s243_s6, 4  ;;  %s1867_s16 = int_to_ptr.vmem [resolvable:$true] %s250_s16 }
  0x6e   : > { %s1403_s19 = scalar_lea.hbm %s1859_s17, 2048  ;;  %s1408_s7 = scalar_lea.hbm %s2069_s1, 4096 }
  0x6f   : > { %p1404_p11 = scmp.ne.s32.totalorder %s1859_s17, %s1403_s19  ;;  %p1405_p13 = pneg %p1863_p7 }
  0x70   : > { %p1409_p8 = scmp.lt.u32.totalorder %s1859_s17, %s2069_s1  ;;  %p1410_p12 = scmp.lt.u32.totalorder %s1408_s7, %s1403_s19 }
  0x71   : > { %p1406_p4 = pnand %p1405_p13, %p1404_p11  ;;  %p1412_p3 = scmp.lt.u32.totalorder %s1403_s19, %s1859_s17 }
  0x72   : > { %p1411_p1 = por %p1410_p12, %p1409_p8 }
  0x73   : > { %p1407_p6 = pneg %p1406_p4 }
  0x74   : > { %p1413_p9 = por %p1412_p3, %p1411_p1 }
  0x76   : > { %p1414_p5 = pnand %p1413_p9, %p1407_p6 }
  0x78   : > { %1417 = shalt.err (!%p1414_p5)
}
  0x79   : > { %s1418_s3 = scalar_lea.vmem %s1867_s16, 2048  ;;  %s1594_s18 = smov [#allocation6]  }
  0x7a   : > { %p1419_p2 = scmp.ne.s32.totalorder %s1867_s16, %s1418_s3  ;;  %s1423_s6 = sshll.u32 %s1594_s18, 4  ;;  %s1424_s6 = int_to_ptr.vmem [resolvable:$false] %s1423_s6 }
  0x7b   : > { %s1425_s8 = scalar_lea.vmem %s1424_s6, 4096  ;;  %p1426_p11 = scmp.lt.s32.totalorder %s1867_s16, %s1424_s6 }
  0x7c   : > { %p1421_p10 = pnand %p1419_p2, %p1405_p13  ;;  %p1427_p4 = scmp.lt.s32.totalorder %s1425_s8, %s1418_s3 }
  0x7e   : > { %p1422_p0 = pneg %p1421_p10  ;;  %p1428_p8 = por %p1427_p4, %p1426_p11 }
  0x80   : > { %p1429_p12 = pnand %p1428_p8, %p1422_p0 }
  0x82   : > { %1432 = shalt.err (!%p1429_p12)
}
  0x83   : > { %1217 = dma.hbm_to_vmem [thread:$0]  (!%p1863_p7), %s1859_s17, 2048, %s1867_s16, %s1871_s11, %s2120_s10, %s2120_s10, %s2119_s27  }
  0x84   : > { %p2124_p13 = scmp.ne.s32.totalorder %s2112_s13, 0 }
  0x85   : > { %s264_s19 = sand.u32 (!%p2124_p13), 1, %s1563_s24   ;;  %p2125_p6 = scmp.ne.s32.totalorder (!%p2124_p13), %s2105_s9, 0 }
  0x86   : > { %262 = sbr.rel (%p2124_p13) target bundleno = 692 (0x2b4), region = 40  ;;  %s910_s12 = sshll.u32 (!%p2124_p13), %s264_s19, 7 }
  0x87   : > { %s265_s7 = scalar_lea.sflag (!%p2124_p13), [#allocation4], %s264_s19  ;;  %s1905_s14 = scalar_lea.vmem (!%p2124_p13), [#allocation3], %s910_s12 }
  0x8d   : > { %1518 = dma.done.wait (%p2125_p6), %s265_s7, 2048  }
  0x8e   : > { %1520 = vsyncadd (%p2125_p6), %s265_s7, 4294965248  ;;  %s2126_s26 = sld [smem:[#allocation18_spill]]  ;;  %s2127_s15 = sld [smem:[#allocation19_spill]] }
  0x8f   : > { %s275_s27 = sand.u32 1, %s1551_s22  }
  0x90   : > { %s911_s10 = sshll.u32 %s275_s27, 7 }
  0x91   : > { %s1913_s17 = scalar_lea.vmem [#allocation6], %s911_s10 }
  0x94   : > { %s273_s3 = sand.u32 1, %s2126_s26   ;;  %p2128_p7 = scmp.ne.s32.totalorder %s2127_s15, 0 }
  0x95   : > { %s274_s13 = scalar_lea.sflag [#allocation7], %s273_s3 }
  0x96   : > { %1522 = dma.done.wait (%p2128_p7), %s274_s13, 2048  }
  0x97   : > { %1524 = vsyncadd (%p2128_p7), %s274_s13, 4294965248  ;;  %p2129_p1 = scmp.eq.s32.totalorder %s2126_s26, 0 }
  0x99   : > { %1526 = dma.done.wait (%p2129_p1), [#allocation7], 2048   ;;  %p2130_p3 = pmov %p2129_p1 }
  0x9a   : > { %s2131_s9 = sld [smem:[#allocation15_spill]]  ;;  %s2132_s6 = sld [smem:[#allocation16_spill]] }
  0x9b   : > { %1528 = vsyncadd (%p2130_p3), [#allocation7], 4294965248 }
  0xa0   : > { %s310_s16 = sand.u32 1, %s2131_s9   ;;  %p914_p9 = scmp.ne.s32.totalorder %s2132_s6, 0 }
  0xa1   : > { %s913_s11 = sshll.u32 %s310_s16, 7  ;;  %v1595_v0 = vmov (!%p914_p9), 0.0  }
  0xa2   : > { %s1926_s18 = scalar_lea.vmem [#allocation9], %s913_s11  ;;  %319 = sbr.rel (%p914_p9) target bundleno = 170 (0xaa), region = 56  ;;  %320 = vst [vmem:[#allocation2] sm:$0xff] (!%p914_p9), %v1595_v0  ;;  %321 = vst [vmem:[#allocation2 + $0x8] sm:$0xff] (!%p914_p9), %v1595_v0 }
  0xa3   : > { %322 = vst [vmem:[#allocation2 + $0x10] sm:$0xff] (!%p914_p9), %v1595_v0  ;;  %323 = vst [vmem:[#allocation2 + $0x18] sm:$0xff] (!%p914_p9), %v1595_v0 }
  0xa4   : > { %324 = vst [vmem:[#allocation2 + $0x20] sm:$0xff] (!%p914_p9), %v1595_v0  ;;  %325 = vst [vmem:[#allocation2 + $0x28] sm:$0xff] (!%p914_p9), %v1595_v0 }
  0xa5   : > { %326 = vst [vmem:[#allocation2 + $0x30] sm:$0xff] (!%p914_p9), %v1595_v0  ;;  %327 = vst [vmem:[#allocation2 + $0x38] sm:$0xff] (!%p914_p9), %v1595_v0 }
  0xa6   : > { %328 = vst [vmem:[#allocation2 + $0x40] sm:$0xff] (!%p914_p9), %v1595_v0  ;;  %329 = vst [vmem:[#allocation2 + $0x48] sm:$0xff] (!%p914_p9), %v1595_v0 }
  0xa7   : > { %330 = vst [vmem:[#allocation2 + $0x50] sm:$0xff] (!%p914_p9), %v1595_v0  ;;  %331 = vst [vmem:[#allocation2 + $0x58] sm:$0xff] (!%p914_p9), %v1595_v0 }
  0xa8   : > { %332 = vst [vmem:[#allocation2 + $0x60] sm:$0xff] (!%p914_p9), %v1595_v0  ;;  %333 = vst [vmem:[#allocation2 + $0x68] sm:$0xff] (!%p914_p9), %v1595_v0 }
  0xa9   : > { %334 = vst [vmem:[#allocation2 + $0x70] sm:$0xff] %v1595_v0  ;;  %335 = vst [vmem:[#allocation2 + $0x78] sm:$0xff] %v1595_v0 }
  0xaa PF: > { %v368_v1 = vld [vmem:[%s1913_s17] sm:$0xff]  ;;  %v369_v2 = vld [vmem:[%s1913_s17 + $0x8] sm:$0xff]  ;;  %v370_v3 = vld [vmem:[%s1913_s17 + $0x10] sm:$0xff]  ;;  %s2133_s8 = sld [smem:[#allocation16_spill]] }
  0xab   : > { %v1101_v4 = vpack.c.bf16 %v369_v2, %v368_v1  ;;  %v371_v5 = vld [vmem:[%s1913_s17 + $0x18] sm:$0xff]  ;;  %v372_v7 = vld [vmem:[%s1913_s17 + $0x20] sm:$0xff]  ;;  %v373_v8 = vld [vmem:[%s1913_s17 + $0x28] sm:$0xff] }
  0xac   : > { %v1105_v6 = vpack.c.bf16 %v371_v5, %v370_v3  ;;  %v1109_v9 = vpack.c.bf16 %v373_v8, %v372_v7  ;;  %v352_v10 = vld [vmem:[%s1905_s14] sm:$0xff]  ;;  %v374_v12 = vld [vmem:[%s1913_s17 + $0x30] sm:$0xff]  ;;  %v375_v13 = vld [vmem:[%s1913_s17 + $0x38] sm:$0xff] }
  0xad   : > { %1102 = vmatprep.subr.bf16.mxu0 %v1101_v4  ;;  %1165 = vmatprep.subr.bf16.mxu1 %v1101_v4  ;;  %v360_v11 = vld [vmem:[%s1905_s14 + $0x40] sm:$0xff]  ;;  %v1113_v14 = vpack.c.bf16 %v375_v13, %v374_v12  ;;  %v377_v16 = vld [vmem:[%s1913_s17 + $0x48] sm:$0xff]  ;;  %v378_v18 = vld [vmem:[%s1913_s17 + $0x50] sm:$0xff] }
  0xae   : > { %1104 = vmatpush3.bf16.msra.mxu0 %v1101_v4  ;;  %1173 = vmatpush3.bf16.msra.mxu1 %v1101_v4  ;;  %v376_v15 = vld [vmem:[%s1913_s17 + $0x40] sm:$0xff]  ;;  %v379_v19 = vld [vmem:[%s1913_s17 + $0x58] sm:$0xff]  ;;  %v381_v22 = vld [vmem:[%s1913_s17 + $0x68] sm:$0xff] }
  0xaf   : > { %1106 = vmatprep.subr.bf16.mxu0 %v1105_v6  ;;  %1166 = vmatprep.subr.bf16.mxu1 %v1105_v6  ;;  %v1117_v17 = vpack.c.bf16 %v377_v16, %v376_v15  ;;  %v1121_v20 = vpack.c.bf16 %v379_v19, %v378_v18  ;;  %v380_v21 = vld [vmem:[%s1913_s17 + $0x60] sm:$0xff]  ;;  %v382_v24 = vld [vmem:[%s1913_s17 + $0x70] sm:$0xff]  ;;  %v383_v25 = vld [vmem:[%s1913_s17 + $0x78] sm:$0xff] }
  0xb0   : > { %1021 = vmatprep.mubr.f32.mxu0 %v352_v10  ;;  %1033 = vmatprep.mubr.f32.mxu1 %v360_v11  ;;  %v1125_v23 = vpack.c.bf16 %v381_v22, %v380_v21  ;;  %v1129_v26 = vpack.c.bf16 %v383_v25, %v382_v24  ;;  %v353_v27 = vld [vmem:[%s1905_s14 + $0x8] sm:$0xff]  ;;  %v354_v29 = vld [vmem:[%s1905_s14 + $0x10] sm:$0xff]  ;;  %v355_v31 = vld [vmem:[%s1905_s14 + $0x18] sm:$0xff]  ;;  %p915_p5 = scmp.ne.s32.totalorder %s2133_s8, 1 }
  0xb1   : > { %v361_v28 = vld [vmem:[%s1905_s14 + $0x48] sm:$0xff]  ;;  %v362_v30 = vld [vmem:[%s1905_s14 + $0x50] sm:$0xff]  ;;  %v363_v32 = vld [vmem:[%s1905_s14 + $0x58] sm:$0xff]  ;;  %s2134_s7 = sld [smem:[#allocation24_spill]] (!%p915_p5) }
  0xb2   : > { %1108 = vmatpush3.bf16.msra.mxu0 %v1105_v6  ;;  %1174 = vmatpush3.bf16.msra.mxu1 %v1105_v6  ;;  %v356_v33 = vld [vmem:[%s1905_s14 + $0x20] sm:$0xff]  ;;  %v357_v35 = vld [vmem:[%s1905_s14 + $0x28] sm:$0xff]  ;;  %v358_v37 = vld [vmem:[%s1905_s14 + $0x30] sm:$0xff] }
  0xb3   : > { %1110 = vmatprep.subr.bf16.mxu0 %v1109_v9  ;;  %1167 = vmatprep.subr.bf16.mxu1 %v1109_v9  ;;  %v364_v34 = vld [vmem:[%s1905_s14 + $0x60] sm:$0xff]  ;;  %v365_v36 = vld [vmem:[%s1905_s14 + $0x68] sm:$0xff]  ;;  %v366_v38 = vld [vmem:[%s1905_s14 + $0x70] sm:$0xff] }
  0xb4   : > { %v359_v39 = vld [vmem:[%s1905_s14 + $0x38] sm:$0xff]  ;;  %v337_v41 = vld [vmem:[#allocation2 + $0x8] sm:$0xff]  ;;  %v336_v43 = vld [vmem:[#allocation2] sm:$0xff] }
  0xb5   : > { %v367_v40 = vld [vmem:[%s1905_s14 + $0x78] sm:$0xff]  ;;  %v345_v42 = vld [vmem:[#allocation2 + $0x48] sm:$0xff]  ;;  %v344_v44 = vld [vmem:[#allocation2 + $0x40] sm:$0xff] }
  0xb6   : > { %1112 = vmatpush3.bf16.msra.mxu0 %v1109_v9  ;;  %1175 = vmatpush3.bf16.msra.mxu1 %v1109_v9  ;;  %v339_v53 = vld [vmem:[#allocation2 + $0x18] sm:$0xff]  ;;  %v338_v55 = vld [vmem:[#allocation2 + $0x10] sm:$0xff]  ;;  %v341_v1 = vld [vmem:[#allocation2 + $0x28] sm:$0xff] }
  0xb7   : > { %1114 = vmatprep.subr.bf16.mxu0 %v1113_v14  ;;  %1168 = vmatprep.subr.bf16.mxu1 %v1113_v14  ;;  %v347_v54 = vld [vmem:[#allocation2 + $0x58] sm:$0xff]  ;;  %v346_v56 = vld [vmem:[#allocation2 + $0x50] sm:$0xff]  ;;  %v349_v2 = vld [vmem:[#allocation2 + $0x68] sm:$0xff] }
  0xb8   : > { %v340_v3 = vld [vmem:[#allocation2 + $0x20] sm:$0xff]  ;;  %v343_v13 = vld [vmem:[#allocation2 + $0x38] sm:$0xff]  ;;  %v342_v15 = vld [vmem:[#allocation2 + $0x30] sm:$0xff] }
  0xb9   : > { %v348_v4 = vld [vmem:[#allocation2 + $0x60] sm:$0xff]  ;;  %v350_v16 = vld [vmem:[#allocation2 + $0x70] sm:$0xff] }
  0xba   : > { %1116 = vmatpush3.bf16.msra.mxu0 %v1113_v14  ;;  %1176 = vmatpush3.bf16.msra.mxu1 %v1113_v14  ;;  %v351_v14 = vld [vmem:[#allocation2 + $0x78] sm:$0xff]  ;;  %v581_v25 = vld [vmem:[#allocation8] sm:$0xff] (!%p915_p5) }
  0xbb   : > { %1118 = vmatprep.subr.bf16.mxu0 %v1117_v17  ;;  %1169 = vmatprep.subr.bf16.mxu1 %v1117_v17 }
  0xbe   : > { %1120 = vmatpush3.bf16.msra.mxu0 %v1117_v17  ;;  %1177 = vmatpush3.bf16.msra.mxu1 %v1117_v17 }
  0xbf   : > { %1122 = vmatprep.subr.bf16.mxu0 %v1121_v20  ;;  %1170 = vmatprep.subr.bf16.mxu1 %v1121_v20 }
  0xc2   : > { %1124 = vmatpush3.bf16.msra.mxu0 %v1121_v20  ;;  %1178 = vmatpush3.bf16.msra.mxu1 %v1121_v20 }
  0xc3   : > { %1126 = vmatprep.subr.bf16.mxu0 %v1125_v23  ;;  %1171 = vmatprep.subr.bf16.mxu1 %v1125_v23 }
  0xc6   : > { %1128 = vmatpush3.bf16.msra.mxu0 %v1125_v23  ;;  %1179 = vmatpush3.bf16.msra.mxu1 %v1125_v23 }
  0xc7   : > { %1130 = vmatprep.subr.bf16.mxu0 %v1129_v26  ;;  %1172 = vmatprep.subr.bf16.mxu1 %v1129_v26 }
  0xca   : > { %1132 = vmatpush3.bf16.msra.mxu0 %v1129_v26  ;;  %1180 = vmatpush3.bf16.msra.mxu1 %v1129_v26  ;;  %v582_v26 = vld [vmem:[#allocation8 + $0x8] sm:$0xff] (!%p915_p5) }
  0xcd   : > { %1022 = vmatmul.mubr.f32.vlgmr.msra.gmra.mrb[0].mxu0 %v353_v27  ;;  %1034 = vmatmul.mubr.f32.vlgmr.msra.gmra.mrb[0].mxu1 %v361_v28  ;;  %v583_v27 = vld [vmem:[#allocation8 + $0x10] sm:$0xff] (!%p915_p5)  ;;  %v1133_v28 = vpack.c.bf16 (!%p915_p5), %v582_v26, %v581_v25 }
  0xce   : > { %1024 = vmatprep.mubr.f32.mxu0 %v354_v29  ;;  %1036 = vmatprep.mubr.f32.mxu1 %v362_v30  ;;  %v584_v29 = vld [vmem:[#allocation8 + $0x18] sm:$0xff] (!%p915_p5) }
  0xcf   : > { %v1137_v30 = vpack.c.bf16 (!%p915_p5), %v584_v29, %v583_v27  ;;  %1134 = vmatprep.subr.bf16.mxu0 (!%p915_p5), %v1133_v28  ;;  %1181 = vmatprep.subr.bf16.mxu1 (!%p915_p5), %v1133_v28 }
  0xd0   : > { %1136 = vmatpush3.bf16.msra.mxu0 (!%p915_p5), %v1133_v28  ;;  %1189 = vmatpush3.bf16.msra.mxu1 (!%p915_p5), %v1133_v28 }
  0xd1   : > { %1025 = vmatmul.mubr.f32.gmra.mrb[2].mxu0 %v355_v31  ;;  %1037 = vmatmul.mubr.f32.gmra.mrb[2].mxu1 %v363_v32  ;;  %v585_v31 = vld [vmem:[#allocation8 + $0x20] sm:$0xff] (!%p915_p5)  ;;  %v586_v32 = vld [vmem:[#allocation8 + $0x28] sm:$0xff] (!%p915_p5) }
  0xd2   : > { %1027 = vmatprep.mubr.f32.mxu0 %v356_v33  ;;  %1039 = vmatprep.mubr.f32.mxu1 %v364_v34  ;;  %v1141_v33 = vpack.c.bf16 (!%p915_p5), %v586_v32, %v585_v31 }
  0xd3   : > { %1138 = vmatprep.subr.bf16.mxu0 (!%p915_p5), %v1137_v30  ;;  %1182 = vmatprep.subr.bf16.mxu1 (!%p915_p5), %v1137_v30 }
  0xd4   : > { %1140 = vmatpush3.bf16.msra.mxu0 (!%p915_p5), %v1137_v30  ;;  %1190 = vmatpush3.bf16.msra.mxu1 (!%p915_p5), %v1137_v30 }
  0xd5   : > { %1028 = vmatmul.mubr.f32.gmra.mrb[4].mxu0 %v357_v35  ;;  %1040 = vmatmul.mubr.f32.gmra.mrb[4].mxu1 %v365_v36  ;;  %v587_v36 = vld [vmem:[#allocation8 + $0x30] sm:$0xff] (!%p915_p5) }
  0xd6   : > { %1030 = vmatprep.mubr.f32.mxu0 %v358_v37  ;;  %1042 = vmatprep.mubr.f32.mxu1 %v366_v38  ;;  %v588_v37 = vld [vmem:[#allocation8 + $0x38] sm:$0xff] (!%p915_p5) }
  0xd7   : > { %1142 = vmatprep.subr.bf16.mxu0 (!%p915_p5), %v1141_v33  ;;  %1183 = vmatprep.subr.bf16.mxu1 (!%p915_p5), %v1141_v33  ;;  %v1145_v38 = vpack.c.bf16 (!%p915_p5), %v588_v37, %v587_v36 }
  0xd8   : > { %1144 = vmatpush3.bf16.msra.mxu0 (!%p915_p5), %v1141_v33  ;;  %1191 = vmatpush3.bf16.msra.mxu1 (!%p915_p5), %v1141_v33 }
  0xd9   : > { %1031 = vmatmul.mubr.f32.gmra.mrb[6].mxu0 %v359_v39  ;;  %1043 = vmatmul.mubr.f32.gmra.mrb[6].mxu1 %v367_v40  ;;  %v589_v39 = vld [vmem:[#allocation8 + $0x40] sm:$0xff] (!%p915_p5)  ;;  %v590_v40 = vld [vmem:[#allocation8 + $0x48] sm:$0xff] (!%p915_p5) }
  0xda   : > { %1146 = vmatprep.subr.bf16.mxu0 (!%p915_p5), %v1145_v38  ;;  %1184 = vmatprep.subr.bf16.mxu1 (!%p915_p5), %v1145_v38 }
  0xdc   : > { %1148 = vmatpush3.bf16.msra.mxu0 (!%p915_p5), %v1145_v38  ;;  %1192 = vmatpush3.bf16.msra.mxu1 (!%p915_p5), %v1145_v38 }
 0x1a0   : > { %v1023_v45 = vpop.f32.mrb[0].mxu0  ;;  %v1035_v46 = vpop.f32.mrb[0].mxu1 }
 0x1a1   : > { %v530_v47 = vadd.f32 %v1023_v45, %v337_v41  ;;  %v538_v48 = vadd.f32 %v1035_v46, %v345_v42  ;;  %v450_v49 = vpop.f32.mrb[1].mxu0  ;;  %v490_v50 = vpop.f32.mrb[1].mxu1  ;;  %v1149_v41 = vpack.c.bf16 (!%p915_p5), %v590_v40, %v589_v39  ;;  %v591_v42 = vld [vmem:[#allocation8 + $0x50] sm:$0xff] (!%p915_p5)  ;;  %v593_v45 = vld [vmem:[#allocation8 + $0x60] sm:$0xff] (!%p915_p5)  ;;  %v594_v46 = vld [vmem:[#allocation8 + $0x68] sm:$0xff] (!%p915_p5) }
 0x1a2   : > { %v529_v51 = vadd.f32 %v450_v49, %v336_v43  ;;  %v537_v52 = vadd.f32 %v490_v50, %v344_v44  ;;  %v592_v43 = vld [vmem:[#allocation8 + $0x58] sm:$0xff] (!%p915_p5) }
 0x1a3   : > { %546 = vst [vmem:[#allocation2 + $0x8] sm:$0xff] %v530_v47  ;;  %554 = vst [vmem:[#allocation2 + $0x48] sm:$0xff] %v538_v48  ;;  %1150 = vmatprep.subr.bf16.mxu0 (!%p915_p5), %v1149_v41  ;;  %1185 = vmatprep.subr.bf16.mxu1 (!%p915_p5), %v1149_v41  ;;  %v1153_v44 = vpack.c.bf16 (!%p915_p5), %v592_v43, %v591_v42  ;;  %v1157_v47 = vpack.c.bf16 (!%p915_p5), %v594_v46, %v593_v45  ;;  %v595_v48 = vld [vmem:[#allocation8 + $0x70] sm:$0xff] (!%p915_p5)  ;;  %v596_v49 = vld [vmem:[#allocation8 + $0x78] sm:$0xff] (!%p915_p5) }
 0x1a4   : > { %545 = vst [vmem:[#allocation2] sm:$0xff] %v529_v51  ;;  %553 = vst [vmem:[#allocation2 + $0x40] sm:$0xff] %v537_v52  ;;  %v1026_v57 = vpop.f32.mrb[2].mxu0  ;;  %v1038_v58 = vpop.f32.mrb[2].mxu1  ;;  %1152 = vmatpush3.bf16.msra.mxu0 (!%p915_p5), %v1149_v41  ;;  %1193 = vmatpush3.bf16.msra.mxu1 (!%p915_p5), %v1149_v41  ;;  %v1161_v50 = vpack.c.bf16 (!%p915_p5), %v596_v49, %v595_v48 }
 0x1a5   : > { %v532_v59 = vadd.f32 %v1026_v57, %v339_v53  ;;  %v540_v60 = vadd.f32 %v1038_v58, %v347_v54  ;;  %v460_v61 = vpop.f32.mrb[3].mxu0  ;;  %v500_v62 = vpop.f32.mrb[3].mxu1  ;;  %1154 = vmatprep.subr.bf16.mxu0 (!%p915_p5), %v1153_v44  ;;  %1186 = vmatprep.subr.bf16.mxu1 (!%p915_p5), %v1153_v44 }
 0x1a6   : > { %v531_v63 = vadd.f32 %v460_v61, %v338_v55  ;;  %v539_v0 = vadd.f32 %v500_v62, %v346_v56 }
 0x1a7   : > { %548 = vst [vmem:[#allocation2 + $0x18] sm:$0xff] %v532_v59  ;;  %556 = vst [vmem:[#allocation2 + $0x58] sm:$0xff] %v540_v60 }
 0x1a8   : > { %547 = vst [vmem:[#allocation2 + $0x10] sm:$0xff] %v531_v63  ;;  %555 = vst [vmem:[#allocation2 + $0x50] sm:$0xff] %v539_v0  ;;  %v1029_v5 = vpop.f32.mrb[4].mxu0  ;;  %v1041_v6 = vpop.f32.mrb[4].mxu1  ;;  %1156 = vmatpush3.bf16.msra.mxu0 (!%p915_p5), %v1153_v44  ;;  %1194 = vmatpush3.bf16.msra.mxu1 (!%p915_p5), %v1153_v44 }
 0x1a9   : > { %v534_v7 = vadd.f32 %v1029_v5, %v341_v1  ;;  %v542_v8 = vadd.f32 %v1041_v6, %v349_v2  ;;  %v470_v9 = vpop.f32.mrb[5].mxu0  ;;  %v510_v10 = vpop.f32.mrb[5].mxu1  ;;  %1158 = vmatprep.subr.bf16.mxu0 (!%p915_p5), %v1157_v47  ;;  %1187 = vmatprep.subr.bf16.mxu1 (!%p915_p5), %v1157_v47  ;;  %v916_v1 = vld [vmem:[%s2134_s7] ss:$0 sm:$0xff] (!%p915_p5) }
 0x1aa   : > { %v533_v11 = vadd.f32 %v470_v9, %v340_v3  ;;  %v541_v12 = vadd.f32 %v510_v10, %v348_v4  ;;  %564 = sbr.rel (%p915_p5) target bundleno = 664 (0x298), region = 60  ;;  %v566_v51 = vld [vmem:[#allocation2 + $0x8] sm:$0xff] (!%p915_p5) }
 0x1ab   : > { %550 = vst [vmem:[#allocation2 + $0x28] sm:$0xff] %v534_v7  ;;  %558 = vst [vmem:[#allocation2 + $0x68] sm:$0xff] %v542_v8  ;;  %v565_v34 = vld [vmem:[#allocation2] sm:$0xff] (!%p915_p5)  ;;  %v574_v52 = vld [vmem:[#allocation2 + $0x48] sm:$0xff] (!%p915_p5) }
 0x1ac   : > { %549 = vst [vmem:[#allocation2 + $0x20] sm:$0xff] %v533_v11  ;;  %557 = vst [vmem:[#allocation2 + $0x60] sm:$0xff] %v541_v12  ;;  %v1032_v17 = vpop.f32.mrb[6].mxu0  ;;  %v1044_v18 = vpop.f32.mrb[6].mxu1  ;;  %v573_v35 = vld [vmem:[#allocation2 + $0x40] sm:$0xff] (!%p915_p5)  ;;  %1077 = vmatprep.mubr.f32.mxu0 (!%p915_p5), %v565_v34  ;;  %1160 = vmatpush3.bf16.msra.mxu0 (!%p915_p5), %v1157_v47 }
 0x1ad   : > { %v536_v19 = vadd.f32 %v1032_v17, %v343_v13  ;;  %v544_v20 = vadd.f32 %v1044_v18, %v351_v14  ;;  %v480_v21 = vpop.f32.mrb[7].mxu0  ;;  %v520_v22 = vpop.f32.mrb[7].mxu1  ;;  %1089 = vmatprep.mubr.f32.mxu1 (!%p915_p5), %v573_v35  ;;  %1195 = vmatpush3.bf16.msra.mxu1 (!%p915_p5), %v1157_v47 }
 0x1ae   : > { %v535_v23 = vadd.f32 %v480_v21, %v342_v15  ;;  %v543_v24 = vadd.f32 %v520_v22, %v350_v16  ;;  %1162 = vmatprep.subr.bf16.mxu0 (!%p915_p5), %v1161_v50  ;;  %1188 = vmatprep.subr.bf16.mxu1 (!%p915_p5), %v1161_v50  ;;  %v568_v55 = vld [vmem:[#allocation2 + $0x18] sm:$0xff] (!%p915_p5) }
 0x1af   : > { %552 = vst [vmem:[#allocation2 + $0x38] sm:$0xff] %v536_v19  ;;  %560 = vst [vmem:[#allocation2 + $0x78] sm:$0xff] %v544_v20  ;;  %v567_v53 = vld [vmem:[#allocation2 + $0x10] sm:$0xff] (!%p915_p5)  ;;  %v576_v56 = vld [vmem:[#allocation2 + $0x58] sm:$0xff] (!%p915_p5) }
 0x1b0   : > { %551 = vst [vmem:[#allocation2 + $0x30] sm:$0xff] %v535_v23  ;;  %559 = vst [vmem:[#allocation2 + $0x70] sm:$0xff] %v543_v24  ;;  %1164 = vmatpush3.bf16.msra.mxu0 (!%p915_p5), %v1161_v50  ;;  %v575_v54 = vld [vmem:[#allocation2 + $0x50] sm:$0xff] (!%p915_p5) }
 0x1b1   : > { %1196 = vmatpush3.bf16.msra.mxu1 %v1161_v50 }
 0x1b2   : > { %v570_v59 = vld [vmem:[#allocation2 + $0x28] sm:$0xff] }
 0x1b3   : > { %1078 = vmatmul.mubr.f32.vlgmr.msra.gmra.mrb[0].mxu0 %v566_v51  ;;  %v569_v57 = vld [vmem:[#allocation2 + $0x20] sm:$0xff]  ;;  %v578_v60 = vld [vmem:[#allocation2 + $0x68] sm:$0xff] }
 0x1b4   : > { %1090 = vmatmul.mubr.f32.vlgmr.msra.gmra.mrb[0].mxu1 %v574_v52  ;;  %1080 = vmatprep.mubr.f32.mxu0 %v567_v53  ;;  %v577_v58 = vld [vmem:[#allocation2 + $0x60] sm:$0xff] }
 0x1b5   : > { %1092 = vmatprep.mubr.f32.mxu1 %v575_v54 }
 0x1b6   : > { %v572_v63 = vld [vmem:[#allocation2 + $0x38] sm:$0xff] }
 0x1b7   : > { %1081 = vmatmul.mubr.f32.gmra.mrb[2].mxu0 %v568_v55  ;;  %v571_v61 = vld [vmem:[#allocation2 + $0x30] sm:$0xff]  ;;  %v580_v0 = vld [vmem:[#allocation2 + $0x78] sm:$0xff] }
 0x1b8   : > { %1093 = vmatmul.mubr.f32.gmra.mrb[2].mxu1 %v576_v56  ;;  %1083 = vmatprep.mubr.f32.mxu0 %v569_v57  ;;  %v579_v62 = vld [vmem:[#allocation2 + $0x70] sm:$0xff] }
 0x1b9   : > { %1095 = vmatprep.mubr.f32.mxu1 %v577_v58 }
 0x1bb   : > { %1084 = vmatmul.mubr.f32.gmra.mrb[4].mxu0 %v570_v59 }
 0x1bc   : > { %1096 = vmatmul.mubr.f32.gmra.mrb[4].mxu1 %v578_v60  ;;  %1086 = vmatprep.mubr.f32.mxu0 %v571_v61 }
 0x1bd   : > { %1098 = vmatprep.mubr.f32.mxu1 %v579_v62 }
 0x1bf   : > { %1087 = vmatmul.mubr.f32.gmra.mrb[6].mxu0 %v572_v63 }
 0x1c0   : > { %1099 = vmatmul.mubr.f32.gmra.mrb[6].mxu1 %v580_v0 }
 0x286   : > { %v1079_v2 = vpop.f32.mrb[0].mxu0 }
 0x287   : > { %v1091_v3 = vpop.f32.mrb[0].mxu1  ;;  %v676_v4 = vadd.f32 %v1079_v2, %v916_v1  ;;  %v670_v6 = vpop.f32.mrb[1].mxu0 }
 0x288   : > { %v716_v5 = vadd.f32 %v1091_v3, %v916_v1  ;;  %v710_v7 = vpop.f32.mrb[1].mxu1  ;;  %v671_v8 = vadd.f32 %v916_v1, %v670_v6 }
 0x289   : > { %v711_v9 = vadd.f32 %v916_v1, %v710_v7  ;;  %750 = vst [vmem:[%s1926_s18 + $0x8] sm:$0xff] %v676_v4 }
 0x28a   : > { %758 = vst [vmem:[%s1926_s18 + $0x48] sm:$0xff] %v716_v5  ;;  %749 = vst [vmem:[%s1926_s18] sm:$0xff] %v671_v8  ;;  %v1082_v10 = vpop.f32.mrb[2].mxu0 }
 0x28b   : > { %757 = vst [vmem:[%s1926_s18 + $0x40] sm:$0xff] %v711_v9  ;;  %v1094_v11 = vpop.f32.mrb[2].mxu1  ;;  %v686_v12 = vadd.f32 %v1082_v10, %v916_v1  ;;  %v680_v14 = vpop.f32.mrb[3].mxu0 }
 0x28c   : > { %v726_v13 = vadd.f32 %v1094_v11, %v916_v1  ;;  %v720_v15 = vpop.f32.mrb[3].mxu1  ;;  %v681_v16 = vadd.f32 %v916_v1, %v680_v14 }
 0x28d   : > { %v721_v17 = vadd.f32 %v916_v1, %v720_v15  ;;  %752 = vst [vmem:[%s1926_s18 + $0x18] sm:$0xff] %v686_v12 }
 0x28e   : > { %760 = vst [vmem:[%s1926_s18 + $0x58] sm:$0xff] %v726_v13  ;;  %751 = vst [vmem:[%s1926_s18 + $0x10] sm:$0xff] %v681_v16  ;;  %v1085_v18 = vpop.f32.mrb[4].mxu0 }
 0x28f   : > { %759 = vst [vmem:[%s1926_s18 + $0x50] sm:$0xff] %v721_v17  ;;  %v1097_v19 = vpop.f32.mrb[4].mxu1  ;;  %v696_v20 = vadd.f32 %v1085_v18, %v916_v1  ;;  %v690_v22 = vpop.f32.mrb[5].mxu0 }
 0x290   : > { %v736_v21 = vadd.f32 %v1097_v19, %v916_v1  ;;  %v730_v23 = vpop.f32.mrb[5].mxu1  ;;  %v691_v24 = vadd.f32 %v916_v1, %v690_v22 }
 0x291   : > { %v731_v25 = vadd.f32 %v916_v1, %v730_v23  ;;  %754 = vst [vmem:[%s1926_s18 + $0x28] sm:$0xff] %v696_v20 }
 0x292   : > { %762 = vst [vmem:[%s1926_s18 + $0x68] sm:$0xff] %v736_v21  ;;  %753 = vst [vmem:[%s1926_s18 + $0x20] sm:$0xff] %v691_v24  ;;  %v1088_v26 = vpop.f32.mrb[6].mxu0 }
 0x293   : > { %761 = vst [vmem:[%s1926_s18 + $0x60] sm:$0xff] %v731_v25  ;;  %v1100_v27 = vpop.f32.mrb[6].mxu1  ;;  %v706_v28 = vadd.f32 %v1088_v26, %v916_v1  ;;  %v700_v30 = vpop.f32.mrb[7].mxu0 }
 0x294   : > { %v746_v29 = vadd.f32 %v1100_v27, %v916_v1  ;;  %v740_v31 = vpop.f32.mrb[7].mxu1  ;;  %v701_v32 = vadd.f32 %v916_v1, %v700_v30 }
 0x295   : > { %v741_v33 = vadd.f32 %v916_v1, %v740_v31  ;;  %756 = vst [vmem:[%s1926_s18 + $0x38] sm:$0xff] %v706_v28 }
 0x296   : > { %764 = vst [vmem:[%s1926_s18 + $0x78] sm:$0xff] %v746_v29  ;;  %755 = vst [vmem:[%s1926_s18 + $0x30] sm:$0xff] %v701_v32 }
 0x297   : > { %763 = vst [vmem:[%s1926_s18 + $0x70] sm:$0xff] %v741_v33 }
 0x298 PF: > { %s2135_s14 = sld [smem:[#allocation17_spill]]  ;;  %s2137_s15 = sld [smem:[#allocation20_spill]] }
 0x299   : > { %s2138_s13 = sld [smem:[#allocation25_spill]]  ;;  %s779_s9 = sshll.u32 %s1926_s18, 4  ;;  %s1988_s9 = int_to_ptr.vmem [resolvable:$true] %s779_s9 }
 0x29a   : > { %s1992_s11 = scalar_lea.sflag [#allocation5], %s310_s16  ;;  %s1433_s6 = scalar_lea.vmem %s1988_s9, 2048 }
 0x29b   : > { %p1434_p2 = scmp.ne.s32.totalorder %s1988_s9, %s1433_s6  ;;  %s1596_s8 = smov [#allocation9]  }
 0x29c   : > { %s1437_s19 = sshll.u32 %s1596_s8, 4  ;;  %s1438_s19 = int_to_ptr.vmem [resolvable:$false] %s1437_s19 }
 0x29d   : > { %s1439_s12 = scalar_lea.vmem %s1438_s19, 4096  ;;  %p1440_p4 = scmp.lt.s32.totalorder %s1988_s9, %s1438_s19 }
 0x29e   : > { %s924_s3 = sshll.u32 %s2135_s14, 11  ;;  %p2139_p10 = scmp.ne.s32.totalorder %s2137_s15, 0 }
 0x29f   : > { %s1985_s17 = scalar_lea.hbm %s2138_s13, %s924_s3  ;;  %p1441_p8 = scmp.lt.s32.totalorder %s1439_s12, %s1433_s6 }
 0x2a0   : > { %p1435_p0 = pnand %p1434_p2, %p2139_p10 }
 0x2a1   : > { %p1442_p12 = por %p1441_p8, %p1440_p4 }
 0x2a2   : > { %p1436_p11 = pneg %p1435_p0 }
 0x2a4   : > { %p1443_p13 = pnand %p1442_p12, %p1436_p11 }
 0x2a6   : > { %1446 = shalt.err (!%p1443_p13)
}
 0x2a7   : > { %s1447_s16 = scalar_lea.hbm %s1985_s17, 2048  ;;  %s1451_s14 = scalar_lea.hbm %s2138_s13, 4096 }
 0x2a8   : > { %p1448_p6 = scmp.ne.s32.totalorder %s1985_s17, %s1447_s16  ;;  %p1452_p3 = scmp.lt.u32.totalorder %s1985_s17, %s2138_s13 }
 0x2a9   : > { %p1453_p9 = scmp.lt.u32.totalorder %s1451_s14, %s1447_s16  ;;  %p1455_p2 = scmp.lt.u32.totalorder %s1447_s16, %s1985_s17 }
 0x2aa   : > { %p1449_p7 = pnand %p1448_p6, %p2139_p10 }
 0x2ab   : > { %p1454_p5 = por %p1453_p9, %p1452_p3 }
 0x2ac   : > { %p1450_p1 = pneg %p1449_p7 }
 0x2ad   : > { %p1456_p0 = por %p1455_p2, %p1454_p5 }
 0x2af   : > { %p1457_p11 = pnand %p1456_p0, %p1450_p1 }
 0x2b1   : > { %1460 = shalt.err (!%p1457_p11)
}
 0x2b2   : > { %s1597_s27 = smov 128   ;;  %s1598_s10 = smov 8  }
 0x2b3   : > { %1205 = dma.vmem_to_hbm [thread:$0]  (%p2139_p10), %s1988_s9, 2048, %s1985_s17, %s1992_s11, %s1597_s27, %s1597_s27, %s1598_s10  }
 0x2b4 PF: > { %s2140_s6 = sld [smem:[#allocation14_spill]]  ;;  %s2141_s8 = sld [smem:[#allocation21_spill]] }
 0x2b5   : > { %p1225_p4 = scmp.ge.s32.totalorder %s1587_s30, 2 }
 0x2ba   : > { %s794_s19 = sand.u32 1, %s2140_s6   ;;  %p2142_p8 = scmp.ne.s32.totalorder %s2141_s8, 0 }
 0x2bb   : > { %s795_s12 = scalar_lea.sflag [#allocation5], %s794_s19 }
 0x2bc   : > { %p1219_p12 = pnand %p1225_p4, %p2142_p8 }
 0x2be   : > { %1530 = dma.done.wait (!%p1219_p12), %s795_s12, 2048  }
 0x2bf   : > { %1532 = vsyncadd (!%p1219_p12), %s795_s12, 4294965248  ;;  %s24_s30 = sadd.s32 1, %s1587_s30   ;;  %s2144_s18 = sld [smem:[#allocation15_spill]] }
 0x2c0   : > { %p2021_p13 = scmp.ge.s32.totalorder %s24_s30, 6   ;;  %s2145_s15 = sld [smem:[#allocation22_spill]] }
 0x2c1   : > { %s2146_s17 = smov %s2164_s23  ;;  %s2147_s19 = smov %s1543_s20 }
 0x2c2   : > { %s2148_s20 = smov %s1792_s21  ;;  %s2149_s21 = smov %s1551_s22 }
 0x2c3   : > { %s2150_s22 = smov %s1555_s4  ;;  %s2151_s4 = smov %s1850_s2 }
 0x2c4   : > { %s2152_s23 = smov %s1563_s24  ;;  %s2153_s24 = smov %s1567_s25 }
 0x2c5   : > { %s2154_s25 = smov %s1795_s5  ;;  %s2155_s26 = smov %s1579_s28 }
 0x2c6   : > { %s2156_s27 = smov %s1583_s29  ;;  %s2157_s28 = smov %s2145_s15 }
 0x2c7   : > { %s2158_s29 = smov %s2146_s17  ;;  %23 = sbr.rel (!%p2021_p13) target bundleno = 16 (0x10), region = 110 }
 0x2ce   :  { %800 = vsyncpa [#allocation4], 1 }
 0x2cf   :  { %802 = vsyncpa [#allocation4 + $0x1], 1 }
 0x2d0   :  { %803 = vsyncpa [#allocation7], 1 }
 0x2d1   :  { %805 = vsyncpa [#allocation7 + $0x1], 1 }
 0x2d2   :  { %806 = vsyncpa [#allocation5], 1 }
 0x2d3   :  { %808 = vsyncpa [#allocation5 + $0x1], 1 }

</bundles_post_ra>
